<compile_context>
chip_gen: v5e
topology: v5e:2x2
jax: 0.10.0
libtpu: 0.0.40
codegen_flags: <defaults>
</compile_context>

<pallas_src>
import functools
import math

import jax
import jax.numpy as jnp
from jax import lax
from jax.experimental import pallas as pl
from jax.experimental.pallas import tpu as pltpu


def _layernorm(x, gamma, beta, eps=1e-5):
    mean = jnp.mean(x, axis=-1, keepdims=True)
    var = jnp.mean(jnp.square(x - mean), axis=-1, keepdims=True)
    return (x - mean) * lax.rsqrt(var + eps) * gamma + beta


def encoder_layer_kernel(src_ref, wq_ref, wk_ref, wv_ref, bq_ref, bk_ref, bv_ref,
                         wo_ref, bo_ref, w1_ref, b1_ref, w2_ref, b2_ref,
                         g1_ref, be1_ref, g2_ref, be2_ref,
                         *out_and_scratch, nhead, need_weights):
    if need_weights:
        out_ref, attn_ref, o_scr = out_and_scratch
    else:
        (out_ref, o_scr), attn_ref = out_and_scratch, None

    h = pl.program_id(1)                      # head index (grid axis 1, "arbitrary")
    x = src_ref[...]                          # (L, E), one batch element, input dtype
    dt = x.dtype                              # MXU operand dtype (no f32 upcasts)

    # ---- this head's attention ---------------------------------------------
    # Per-head projections from lane-aligned (E, hd) weight blocks; f32 accumulation.
    q = jnp.dot(x, wq_ref[...], preferred_element_type=jnp.float32) \
        + bq_ref[...].astype(jnp.float32)     # 1/sqrt(hd) already folded into Wq/bq
    k = jnp.dot(x, wk_ref[...], preferred_element_type=jnp.float32) \
        + bk_ref[...].astype(jnp.float32)
    v = jnp.dot(x, wv_ref[...], preferred_element_type=jnp.float32) \
        + bv_ref[...].astype(jnp.float32)

    # scores: contract head_dim of q and k directly ("NT" matmul, no transpose).
    s = lax.dot_general(q.astype(dt), k.astype(dt), (((1,), (1,)), ((), ())),
                        preferred_element_type=jnp.float32)               # (L, L)
    m = jnp.max(s, axis=-1, keepdims=True)
    e = jnp.exp(s - m)
    p = e * pl.reciprocal(jnp.sum(e, axis=-1, keepdims=True), approx=True)  # EUP, not VALU

    o = jnp.dot(p.astype(dt), v.astype(dt), preferred_element_type=jnp.float32)  # (L, hd)
    o_scr[h] = o.astype(o_scr.dtype)          # aligned store at the leading (head) index

    if need_weights:
        @pl.when(h == 0)
        def _init_attn():
            attn_ref[...] = jnp.zeros_like(attn_ref)
        attn_ref[...] = attn_ref[...] + p * (1.0 / nhead)   # head-averaged probs (f32)

    # ---- after the last head: output proj, residual+LN1, FFN, residual+LN2 --
    @pl.when(h == nhead - 1)
    def _finish():
        # Assemble the concatenated attention output once, then a single
        # full-depth (L, E) x (E, E) output projection.
        cat = jnp.concatenate([o_scr[i] for i in range(nhead)], axis=-1)   # (L, E)
        src2 = jnp.dot(cat, wo_ref[...], preferred_element_type=jnp.float32) \
               + bo_ref[...].astype(jnp.float32)
        y = _layernorm(x.astype(jnp.float32) + src2,
                       g1_ref[...].astype(jnp.float32),
                       be1_ref[...].astype(jnp.float32))
        hid = jnp.dot(y.astype(dt), w1_ref[...], preferred_element_type=jnp.float32) \
              + b1_ref[...].astype(jnp.float32)
        hid = jnp.maximum(hid, 0.0)                                        # relu
        ff = jnp.dot(hid.astype(dt), w2_ref[...], preferred_element_type=jnp.float32) \
             + b2_ref[...].astype(jnp.float32)
        z = _layernorm(y + ff,
                       g2_ref[...].astype(jnp.float32),
                       be2_ref[...].astype(jnp.float32))
        out_ref[...] = z.astype(out_ref.dtype)


def _vmem_limit_bytes(L, E, F, nhead, hd, itemsize):
    """Rough VMEM residency estimate for CompilerParams.vmem_limit_bytes."""
    w = itemsize
    per_head = 2 * 3 * (E * hd + hd) * w                    # Wq/Wk/Wv(+bias), 2 buffers
    invariant = (E * E + 2 * E * F + 2 * F + 8 * E) * w     # Wo/W1/W2/biases/LN, 1 buffer
    io = 2 * (2 * L * E * w + L * L * 4)                    # src/out blocks + f32 attn
    scratch = nhead * L * hd * w                            # per-head output scratch
    temps = 6 * L * L * 4 + 2 * L * F * 4 + 8 * L * E * 4   # in-flight f32 temporaries
    est = per_head + invariant + io + scratch + temps
    return int(min(64 * 2**20, max(16 * 2**20, 2 * est)))


def transformer_encoder_layer(src, params, *, nhead, need_weights=True):
    """Pallas TransformerEncoderLayer.forward (eval mode).

    src: (L, N, E) (PyTorch MultiheadAttention layout).
    Linear weights stored transposed vs. PyTorch so that out = x @ W + b.
    Returns (out (L, N, E), attn_weights (N, L, L) float32 head-averaged or None).
    """
    L, N, E = src.shape
    F = params["w1"].shape[1]
    if E % nhead != 0:
        raise ValueError("d_model must be divisible by nhead")
    hd = E // nhead
    dt = src.dtype
    scale = 1.0 / math.sqrt(hd)

    # Batch-major view so each grid step sees a plain 2-D (L, E) tile.
    src_b = jnp.transpose(src, (1, 0, 2))                    # (N, L, E), wrapper glue

    # ---- wrapper-side weight prep: per-head, lane-aligned slabs --------------
    w_in, b_in = params["w_in"], params["b_in"]

    def _w_heads(w2d):                                       # (E, E) -> (H, E, hd)
        return jnp.transpose(w2d.reshape(E, nhead, hd), (1, 0, 2))

    def _b_heads(b2d):                                       # (1, E) -> (H, 1, hd)
        return b2d.reshape(nhead, 1, hd)

    wq = (_w_heads(w_in[:, :E]) * scale).astype(dt)          # fold 1/sqrt(hd) into Q
    bq = (_b_heads(b_in[:, :E]) * scale).astype(dt)
    wk = _w_heads(w_in[:, E:2 * E]).astype(dt)
    bk = _b_heads(b_in[:, E:2 * E]).astype(dt)
    wv = _w_heads(w_in[:, 2 * E:]).astype(dt)
    bv = _b_heads(b_in[:, 2 * E:]).astype(dt)
    cast = lambda name: params[name].astype(dt)
    wo, bo = cast("wo"), cast("bo")
    w1, b1, w2, b2 = cast("w1"), cast("b1"), cast("w2"), cast("b2")
    g1, be1, g2, be2 = cast("g1"), cast("be1"), cast("g2"), cast("be2")

    kernel = functools.partial(encoder_layer_kernel, nhead=nhead,
                               need_weights=need_weights)

    batch_map = lambda n, h: (n, 0, 0)
    head_map = lambda n, h: (h, 0, 0)
    rep = lambda n, h: (0, 0)
    single = pl.Buffered(1)          # grid-invariant blocks: no second pipeline buffer

    in_specs = [
        pl.BlockSpec((None, L, E), batch_map),               # src (one batch element)
        pl.BlockSpec((None, E, hd), head_map),               # Wq[h]
        pl.BlockSpec((None, E, hd), head_map),               # Wk[h]
        pl.BlockSpec((None, E, hd), head_map),               # Wv[h]
        pl.BlockSpec((None, 1, hd), head_map),               # bq[h]
        pl.BlockSpec((None, 1, hd), head_map),               # bk[h]
        pl.BlockSpec((None, 1, hd), head_map),               # bv[h]
        pl.BlockSpec((E, E), rep, pipeline_mode=single),     # Wo
        pl.BlockSpec((1, E), rep, pipeline_mode=single),     # bo
        pl.BlockSpec((E, F), rep, pipeline_mode=single),     # W1
        pl.BlockSpec((1, F), rep, pipeline_mode=single),     # b1
        pl.BlockSpec((F, E), rep, pipeline_mode=single),     # W2
        pl.BlockSpec((1, E), rep, pipeline_mode=single),     # b2
        pl.BlockSpec((1, E), rep, pipeline_mode=single),     # gamma1
        pl.BlockSpec((1, E), rep, pipeline_mode=single),     # beta1
        pl.BlockSpec((1, E), rep, pipeline_mode=single),     # gamma2
        pl.BlockSpec((1, E), rep, pipeline_mode=single),     # beta2
    ]

    out_shapes = [jax.ShapeDtypeStruct((N, L, E), dt)]
    out_specs = [pl.BlockSpec((None, L, E), batch_map)]
    if need_weights:
        out_shapes.append(jax.ShapeDtypeStruct((N, L, L), jnp.float32))
        out_specs.append(pl.BlockSpec((None, L, L), batch_map))

    results = pl.pallas_call(
        kernel,
        out_shape=tuple(out_shapes),
        grid_spec=pltpu.PrefetchScalarGridSpec(
            num_scalar_prefetch=0,
            grid=(N, nhead),                 # batch parallel (megacore), heads arbitrary
            in_specs=in_specs,
            out_specs=tuple(out_specs),
            scratch_shapes=[pltpu.VMEM((nhead, L, hd), dt)],
        ),
        compiler_params=pltpu.CompilerParams(
            dimension_semantics=("parallel", "arbitrary"),
            vmem_limit_bytes=_vmem_limit_bytes(L, E, F, nhead, hd,
                                               jnp.dtype(dt).itemsize)),
    )(src_b, wq, wk, wv, bq, bk, bv, wo, bo, w1, b1, w2, b2, g1, be1, g2, be2)

    out = jnp.transpose(results[0], (1, 0, 2))               # back to (L, N, E)
    attn_w = results[1] if need_weights else None
    return out, attn_w


def _reference(src, params, nhead):
    """Pure-JAX reference mirroring the PyTorch forward (eval mode)."""
    L, N, E = src.shape
    hd = E // nhead
    qkv = src @ params["w_in"] + params["b_in"]              # (L, N, 3E)
    q, k, v = qkv[..., :E], qkv[..., E:2 * E], qkv[..., 2 * E:]
    q = q * (1.0 / math.sqrt(hd))

    def heads(t):                                            # (L, N, E) -> (N, H, L, hd)
        return jnp.transpose(t.reshape(L, N, nhead, hd), (1, 2, 0, 3))

    qh, kh, vh = heads(q), heads(k), heads(v)
    s = jnp.einsum("nhqd,nhkd->nhqk", qh, kh)
    p = jax.nn.softmax(s, axis=-1)
    o = jnp.einsum("nhqk,nhkd->nhqd", p, vh)                 # (N, H, L, hd)
    o = jnp.transpose(o, (2, 0, 1, 3)).reshape(L, N, E)
    src2 = o @ params["wo"] + params["bo"]

    x = _layernorm(src + src2, params["g1"], params["be1"])
    ff = jax.nn.relu(x @ params["w1"] + params["b1"]) @ params["w2"] + params["b2"]
    out = _layernorm(x + ff, params["g2"], params["be2"])
    return out, jnp.mean(p, axis=1)


if __name__ == "__main__":
    key = jax.random.PRNGKey(0)
    ks = jax.random.split(key, 13)

    # seq=8, batch=2, d_model=32, nhead=4, dim_feedforward=64
    L, N, E, NH, F = 8, 2, 32, 4, 64

    def u(k, shape, scale=0.1):
        return jax.random.uniform(k, shape, minval=-scale, maxval=scale,
                                  dtype=jnp.float32)

    src = jax.random.normal(ks[0], (L, N, E), dtype=jnp.float32)
    params = dict(
        w_in=u(ks[1], (E, 3 * E)), b_in=u(ks[2], (1, 3 * E)),
        wo=u(ks[3], (E, E)),       bo=u(ks[4], (1, E)),
        w1=u(ks[5], (E, F)),       b1=u(ks[6], (1, F)),
        w2=u(ks[7], (F, E)),       b2=u(ks[8], (1, E)),
        g1=1.0 + u(ks[9], (1, E)),  be1=u(ks[10], (1, E)),
        g2=1.0 + u(ks[11], (1, E)), be2=u(ks[12], (1, E)),
    )

    out, attn_w = transformer_encoder_layer(src, params, nhead=NH)
    jax.block_until_ready((out, attn_w))

    ref_out, ref_w = _reference(src, params, NH)
    assert out.shape == (L, N, E) and attn_w.shape == (N, L, L)
    # tolerance covers the EUP approximate-reciprocal softmax (review-directed)
    assert jnp.allclose(out, ref_out, atol=5e-3, rtol=5e-3), \
        float(jnp.max(jnp.abs(out - ref_out)))
    assert jnp.allclose(attn_w, ref_w, atol=5e-3, rtol=5e-3), \
        float(jnp.max(jnp.abs(attn_w - ref_w)))

    # need_weights=False path: drops the (N, L, L) HBM write stream entirely.
    out_nw, none_w = transformer_encoder_layer(src, params, nhead=NH,
                                               need_weights=False)
    jax.block_until_ready(out_nw)
    assert none_w is None
    assert jnp.allclose(out_nw, out, atol=1e-5, rtol=1e-5)

    print("KERNEL_OK")
</pallas_src>

<mosaic_0001>
module attributes {stable_mosaic.version = 11 : i64} {
  func.func @encoder_layer_kernel(%arg0: i32, %arg1: i32, %arg2: memref<1x8x32xf32, #tpu.memory_space<vmem>>, %arg3: memref<1x32x8xf32, #tpu.memory_space<vmem>>, %arg4: memref<1x32x8xf32, #tpu.memory_space<vmem>>, %arg5: memref<1x32x8xf32, #tpu.memory_space<vmem>>, %arg6: memref<1x1x8xf32, #tpu.memory_space<vmem>>, %arg7: memref<1x1x8xf32, #tpu.memory_space<vmem>>, %arg8: memref<1x1x8xf32, #tpu.memory_space<vmem>>, %arg9: memref<32x32xf32, #tpu.memory_space<vmem>>, %arg10: memref<1x32xf32, #tpu.memory_space<vmem>>, %arg11: memref<32x64xf32, #tpu.memory_space<vmem>>, %arg12: memref<1x64xf32, #tpu.memory_space<vmem>>, %arg13: memref<64x32xf32, #tpu.memory_space<vmem>>, %arg14: memref<1x32xf32, #tpu.memory_space<vmem>>, %arg15: memref<1x32xf32, #tpu.memory_space<vmem>>, %arg16: memref<1x32xf32, #tpu.memory_space<vmem>>, %arg17: memref<1x32xf32, #tpu.memory_space<vmem>>, %arg18: memref<1x32xf32, #tpu.memory_space<vmem>>, %arg19: memref<1x8x32xf32, #tpu.memory_space<vmem>>, %arg20: memref<1x8x8xf32, #tpu.memory_space<vmem>>, %arg21: memref<4x8x8xf32, #tpu.memory_space<vmem>>) attributes {dimension_semantics = [#tpu.dimension_semantics<parallel>, #tpu.dimension_semantics<arbitrary>], iteration_bounds = array<i64: 2, 4>, scalar_prefetch = 0 : i64, scratch_operands = 1 : i64, tpu.core_type = #tpu.core_type<tc>, window_params = [{transform_indices = @transform_0, window_bounds = array<i64: 1, 8, 32>}, {transform_indices = @transform_1, window_bounds = array<i64: 1, 32, 8>}, {transform_indices = @transform_2, window_bounds = array<i64: 1, 32, 8>}, {transform_indices = @transform_3, window_bounds = array<i64: 1, 32, 8>}, {transform_indices = @transform_4, window_bounds = array<i64: 1, 1, 8>}, {transform_indices = @transform_5, window_bounds = array<i64: 1, 1, 8>}, {transform_indices = @transform_6, window_bounds = array<i64: 1, 1, 8>}, {pipeline_mode = #tpu.pipeline_mode<synchronous>, transform_indices = @transform_7, window_bounds = array<i64: 32, 32>}, {pipeline_mode = #tpu.pipeline_mode<synchronous>, transform_indices = @transform_8, window_bounds = array<i64: 1, 32>}, {pipeline_mode = #tpu.pipeline_mode<synchronous>, transform_indices = @transform_9, window_bounds = array<i64: 32, 64>}, {pipeline_mode = #tpu.pipeline_mode<synchronous>, transform_indices = @transform_10, window_bounds = array<i64: 1, 64>}, {pipeline_mode = #tpu.pipeline_mode<synchronous>, transform_indices = @transform_11, window_bounds = array<i64: 64, 32>}, {pipeline_mode = #tpu.pipeline_mode<synchronous>, transform_indices = @transform_12, window_bounds = array<i64: 1, 32>}, {pipeline_mode = #tpu.pipeline_mode<synchronous>, transform_indices = @transform_13, window_bounds = array<i64: 1, 32>}, {pipeline_mode = #tpu.pipeline_mode<synchronous>, transform_indices = @transform_14, window_bounds = array<i64: 1, 32>}, {pipeline_mode = #tpu.pipeline_mode<synchronous>, transform_indices = @transform_15, window_bounds = array<i64: 1, 32>}, {pipeline_mode = #tpu.pipeline_mode<synchronous>, transform_indices = @transform_16, window_bounds = array<i64: 1, 32>}, {transform_indices = @transform_17, window_bounds = array<i64: 1, 8, 32>}, {transform_indices = @transform_18, window_bounds = array<i64: 1, 8, 8>}]} {
    %c0 = arith.constant 0 : index
    %c0_0 = arith.constant 0 : index
    %c0_1 = arith.constant 0 : index
    %0 = vector.load %arg2[%c0, %c0_0, %c0_1] : memref<1x8x32xf32, #tpu.memory_space<vmem>>, vector<1x8x32xf32>
    %1 = vector.shape_cast %0 : vector<1x8x32xf32> to vector<8x32xf32>
    %c0_2 = arith.constant 0 : index
    %c0_3 = arith.constant 0 : index
    %c0_4 = arith.constant 0 : index
    %2 = vector.load %arg3[%c0_2, %c0_3, %c0_4] : memref<1x32x8xf32, #tpu.memory_space<vmem>>, vector<1x32x8xf32>
    %3 = vector.shape_cast %2 : vector<1x32x8xf32> to vector<32x8xf32>
    %cst = arith.constant dense<0.000000e+00> : vector<8x8xf32>
    %4 = tpu.matmul %1, %3, %cst {dimension_numbers = #tpu.dot_dimension_numbers<[1], [0], [0], [1], [0, 0, 1, 1], [], []>} : vector<8x32xf32>, vector<32x8xf32>, vector<8x8xf32> -> vector<8x8xf32>
    %c0_5 = arith.constant 0 : index
    %c0_6 = arith.constant 0 : index
    %c0_7 = arith.constant 0 : index
    %5 = vector.load %arg6[%c0_5, %c0_6, %c0_7] : memref<1x1x8xf32, #tpu.memory_space<vmem>>, vector<1x1x8xf32>
    %6 = vector.shape_cast %5 : vector<1x1x8xf32> to vector<1x8xf32>
    %7 = vector.broadcast %6 : vector<1x8xf32> to vector<8x8xf32>
    %8 = arith.addf %4, %7 : vector<8x8xf32>
    %c0_8 = arith.constant 0 : index
    %c0_9 = arith.constant 0 : index
    %c0_10 = arith.constant 0 : index
    %9 = vector.load %arg4[%c0_8, %c0_9, %c0_10] : memref<1x32x8xf32, #tpu.memory_space<vmem>>, vector<1x32x8xf32>
    %10 = vector.shape_cast %9 : vector<1x32x8xf32> to vector<32x8xf32>
    %cst_11 = arith.constant dense<0.000000e+00> : vector<8x8xf32>
    %11 = tpu.matmul %1, %10, %cst_11 {dimension_numbers = #tpu.dot_dimension_numbers<[1], [0], [0], [1], [0, 0, 1, 1], [], []>} : vector<8x32xf32>, vector<32x8xf32>, vector<8x8xf32> -> vector<8x8xf32>
    %c0_12 = arith.constant 0 : index
    %c0_13 = arith.constant 0 : index
    %c0_14 = arith.constant 0 : index
    %12 = vector.load %arg7[%c0_12, %c0_13, %c0_14] : memref<1x1x8xf32, #tpu.memory_space<vmem>>, vector<1x1x8xf32>
    %13 = vector.shape_cast %12 : vector<1x1x8xf32> to vector<1x8xf32>
    %14 = vector.broadcast %13 : vector<1x8xf32> to vector<8x8xf32>
    %15 = arith.addf %11, %14 : vector<8x8xf32>
    %c0_15 = arith.constant 0 : index
    %c0_16 = arith.constant 0 : index
    %c0_17 = arith.constant 0 : index
    %16 = vector.load %arg5[%c0_15, %c0_16, %c0_17] : memref<1x32x8xf32, #tpu.memory_space<vmem>>, vector<1x32x8xf32>
    %17 = vector.shape_cast %16 : vector<1x32x8xf32> to vector<32x8xf32>
    %cst_18 = arith.constant dense<0.000000e+00> : vector<8x8xf32>
    %18 = tpu.matmul %1, %17, %cst_18 {dimension_numbers = #tpu.dot_dimension_numbers<[1], [0], [0], [1], [0, 0, 1, 1], [], []>} : vector<8x32xf32>, vector<32x8xf32>, vector<8x8xf32> -> vector<8x8xf32>
    %c0_19 = arith.constant 0 : index
    %c0_20 = arith.constant 0 : index
    %c0_21 = arith.constant 0 : index
    %19 = vector.load %arg8[%c0_19, %c0_20, %c0_21] : memref<1x1x8xf32, #tpu.memory_space<vmem>>, vector<1x1x8xf32>
    %20 = vector.shape_cast %19 : vector<1x1x8xf32> to vector<1x8xf32>
    %21 = vector.broadcast %20 : vector<1x8xf32> to vector<8x8xf32>
    %22 = arith.addf %18, %21 : vector<8x8xf32>
    %cst_22 = arith.constant dense<0.000000e+00> : vector<8x8xf32>
    %23 = tpu.matmul %8, %15, %cst_22 {dimension_numbers = #tpu.dot_dimension_numbers<[1], [1], [0], [0], [0, 0, 1, 0], [], []>} : vector<8x8xf32>, vector<8x8xf32>, vector<8x8xf32> -> vector<8x8xf32>
    %cst_23 = arith.constant dense<0xFF800000> : vector<8xf32>
    %24 = vector.multi_reduction <maximumf>, %23, %cst_23 [1] : vector<8x8xf32> to vector<8xf32>
    %25 = vector.shape_cast %24 : vector<8xf32> to vector<8x1xf32>
    %26 = vector.broadcast %25 : vector<8x1xf32> to vector<8x8xf32>
    %27 = arith.subf %23, %26 : vector<8x8xf32>
    %28 = math.exp %27 : vector<8x8xf32>
    %cst_24 = arith.constant dense<0.000000e+00> : vector<8xf32>
    %29 = vector.multi_reduction <add>, %28, %cst_24 [1] : vector<8x8xf32> to vector<8xf32>
    %30 = vector.shape_cast %29 : vector<8xf32> to vector<8x1xf32>
    %31 = tpu.reciprocal %30 {approx = true} : vector<8x1xf32> -> vector<8x1xf32>
    %32 = vector.broadcast %31 : vector<8x1xf32> to vector<8x8xf32>
    %33 = arith.mulf %28, %32 : vector<8x8xf32>
    %cst_25 = arith.constant dense<0.000000e+00> : vector<8x8xf32>
    %34 = tpu.matmul %33, %22, %cst_25 {dimension_numbers = #tpu.dot_dimension_numbers<[1], [0], [0], [1], [0, 0, 1, 1], [], []>} : vector<8x8xf32>, vector<8x8xf32>, vector<8x8xf32> -> vector<8x8xf32>
    %35 = arith.index_cast %arg1 : i32 to index
    %c0_26 = arith.constant 0 : index
    %c0_27 = arith.constant 0 : index
    %36 = vector.load %arg21[%35, %c0_26, %c0_27] : memref<4x8x8xf32, #tpu.memory_space<vmem>>, vector<1x8x8xf32>
    %37 = vector.shape_cast %36 : vector<1x8x8xf32> to vector<8x8xf32>
    %38 = vector.shape_cast %34 : vector<8x8xf32> to vector<1x8x8xf32>
    tpu.vector_store %arg21[%35, %c0_26, %c0_27], %38 {strides = array<i32>} : memref<4x8x8xf32, #tpu.memory_space<vmem>>, vector<1x8x8xf32>,
    %c0_i32 = arith.constant 0 : i32
    %39 = arith.cmpi eq, %arg1, %c0_i32 : i32
    %40 = arith.extui %39 : i1 to i32
    %c0_i32_28 = arith.constant 0 : i32
    %41 = arith.cmpi ne, %40, %c0_i32_28 : i32
    scf.if %41 {
      %cst_37 = arith.constant 0.000000e+00 : f32
      %53 = vector.broadcast %cst_37 : f32 to vector<8x8xf32>
      %c0_38 = arith.constant 0 : index
      %c0_39 = arith.constant 0 : index
      %c0_40 = arith.constant 0 : index
      %54 = vector.load %arg20[%c0_38, %c0_39, %c0_40] : memref<1x8x8xf32, #tpu.memory_space<vmem>>, vector<1x8x8xf32>
      %55 = vector.shape_cast %54 : vector<1x8x8xf32> to vector<8x8xf32>
      %56 = vector.shape_cast %53 : vector<8x8xf32> to vector<1x8x8xf32>
      tpu.vector_store %arg20[%c0_38, %c0_39, %c0_40], %56 {strides = array<i32>} : memref<1x8x8xf32, #tpu.memory_space<vmem>>, vector<1x8x8xf32>,
    } else {
    }
    %c0_29 = arith.constant 0 : index
    %c0_30 = arith.constant 0 : index
    %c0_31 = arith.constant 0 : index
    %42 = vector.load %arg20[%c0_29, %c0_30, %c0_31] : memref<1x8x8xf32, #tpu.memory_space<vmem>>, vector<1x8x8xf32>
    %43 = vector.shape_cast %42 : vector<1x8x8xf32> to vector<8x8xf32>
    %cst_32 = arith.constant 2.500000e-01 : f32
    %44 = vector.broadcast %cst_32 : f32 to vector<8x8xf32>
    %45 = arith.mulf %33, %44 : vector<8x8xf32>
    %46 = arith.addf %43, %45 : vector<8x8xf32>
    %c0_33 = arith.constant 0 : index
    %c0_34 = arith.constant 0 : index
    %c0_35 = arith.constant 0 : index
    %47 = vector.load %arg20[%c0_33, %c0_34, %c0_35] : memref<1x8x8xf32, #tpu.memory_space<vmem>>, vector<1x8x8xf32>
    %48 = vector.shape_cast %47 : vector<1x8x8xf32> to vector<8x8xf32>
    %49 = vector.shape_cast %46 : vector<8x8xf32> to vector<1x8x8xf32>
    tpu.vector_store %arg20[%c0_33, %c0_34, %c0_35], %49 {strides = array<i32>} : memref<1x8x8xf32, #tpu.memory_space<vmem>>, vector<1x8x8xf32>,
    %c3_i32 = arith.constant 3 : i32
    %50 = arith.cmpi eq, %arg1, %c3_i32 : i32
    %51 = arith.extui %50 : i1 to i32
    %c0_i32_36 = arith.constant 0 : i32
    %52 = arith.cmpi ne, %51, %c0_i32_36 : i32
    scf.if %52 {
      %c0_37 = arith.constant 0 : index
      %c0_38 = arith.constant 0 : index
      %c0_39 = arith.constant 0 : index
      %53 = vector.load %arg21[%c0_37, %c0_38, %c0_39] : memref<4x8x8xf32, #tpu.memory_space<vmem>>, vector<1x8x8xf32>
      %54 = vector.shape_cast %53 : vector<1x8x8xf32> to vector<8x8xf32>
      %c1 = arith.constant 1 : index
      %c0_40 = arith.constant 0 : index
      %c0_41 = arith.constant 0 : index
      %55 = vector.load %arg21[%c1, %c0_40, %c0_41] : memref<4x8x8xf32, #tpu.memory_space<vmem>>, vector<1x8x8xf32>
      %56 = vector.shape_cast %55 : vector<1x8x8xf32> to vector<8x8xf32>
      %c2 = arith.constant 2 : index
      %c0_42 = arith.constant 0 : index
      %c0_43 = arith.constant 0 : index
      %57 = vector.load %arg21[%c2, %c0_42, %c0_43] : memref<4x8x8xf32, #tpu.memory_space<vmem>>, vector<1x8x8xf32>
      %58 = vector.shape_cast %57 : vector<1x8x8xf32> to vector<8x8xf32>
      %c3 = arith.constant 3 : index
      %c0_44 = arith.constant 0 : index
      %c0_45 = arith.constant 0 : index
      %59 = vector.load %arg21[%c3, %c0_44, %c0_45] : memref<4x8x8xf32, #tpu.memory_space<vmem>>, vector<1x8x8xf32>
      %60 = vector.shape_cast %59 : vector<1x8x8xf32> to vector<8x8xf32>
      %61 = tpu.concatenate %54, %56, %58, %60 in 1 : vector<8x8xf32>, vector<8x8xf32>, vector<8x8xf32>, vector<8x8xf32> -> vector<8x32xf32>
      %c0_46 = arith.constant 0 : index
      %c0_47 = arith.constant 0 : index
      %62 = vector.load %arg9[%c0_46, %c0_47] : memref<32x32xf32, #tpu.memory_space<vmem>>, vector<32x32xf32>
      %cst_48 = arith.constant dense<0.000000e+00> : vector<8x32xf32>
      %63 = tpu.matmul %61, %62, %cst_48 {dimension_numbers = #tpu.dot_dimension_numbers<[1], [0], [0], [1], [0, 0, 1, 1], [], []>} : vector<8x32xf32>, vector<32x32xf32>, vector<8x32xf32> -> vector<8x32xf32>
      %c0_49 = arith.constant 0 : index
      %c0_50 = arith.constant 0 : index
      %64 = vector.load %arg10[%c0_49, %c0_50] : memref<1x32xf32, #tpu.memory_space<vmem>>, vector<1x32xf32>
      %65 = vector.broadcast %64 : vector<1x32xf32> to vector<8x32xf32>
      %66 = arith.addf %63, %65 : vector<8x32xf32>
      %67 = arith.addf %1, %66 : vector<8x32xf32>
      %c0_51 = arith.constant 0 : index
      %c0_52 = arith.constant 0 : index
      %68 = vector.load %arg15[%c0_51, %c0_52] : memref<1x32xf32, #tpu.memory_space<vmem>>, vector<1x32xf32>
      %c0_53 = arith.constant 0 : index
      %c0_54 = arith.constant 0 : index
      %69 = vector.load %arg16[%c0_53, %c0_54] : memref<1x32xf32, #tpu.memory_space<vmem>>, vector<1x32xf32>
      %cst_55 = arith.constant dense<0.000000e+00> : vector<8xf32>
      %70 = vector.multi_reduction <add>, %67, %cst_55 [1] : vector<8x32xf32> to vector<8xf32>
      %71 = vector.shape_cast %70 : vector<8xf32> to vector<8x1xf32>
      %cst_56 = arith.constant 3.200000e+01 : f32
      %72 = vector.broadcast %cst_56 : f32 to vector<8x1xf32>
      %73 = arith.divf %71, %72 : vector<8x1xf32>
      %74 = vector.broadcast %73 : vector<8x1xf32> to vector<8x32xf32>
      %75 = arith.subf %67, %74 : vector<8x32xf32>
      %76 = arith.mulf %75, %75 : vector<8x32xf32>
      %cst_57 = arith.constant dense<0.000000e+00> : vector<8xf32>
      %77 = vector.multi_reduction <add>, %76, %cst_57 [1] : vector<8x32xf32> to vector<8xf32>
      %78 = vector.shape_cast %77 : vector<8xf32> to vector<8x1xf32>
      %cst_58 = arith.constant 3.200000e+01 : f32
      %79 = vector.broadcast %cst_58 : f32 to vector<8x1xf32>
      %80 = arith.divf %78, %79 : vector<8x1xf32>
      %81 = vector.broadcast %73 : vector<8x1xf32> to vector<8x32xf32>
      %82 = arith.subf %67, %81 : vector<8x32xf32>
      %cst_59 = arith.constant 9.99999974E-6 : f32
      %83 = vector.broadcast %cst_59 : f32 to vector<8x1xf32>
      %84 = arith.addf %80, %83 : vector<8x1xf32>
      %85 = math.rsqrt %84 : vector<8x1xf32>
      %86 = vector.broadcast %85 : vector<8x1xf32> to vector<8x32xf32>
      %87 = arith.mulf %82, %86 : vector<8x32xf32>
      %88 = vector.broadcast %68 : vector<1x32xf32> to vector<8x32xf32>
      %89 = arith.mulf %87, %88 : vector<8x32xf32>
      %90 = vector.broadcast %69 : vector<1x32xf32> to vector<8x32xf32>
      %91 = arith.addf %89, %90 : vector<8x32xf32>
      %c0_60 = arith.constant 0 : index
      %c0_61 = arith.constant 0 : index
      %92 = vector.load %arg11[%c0_60, %c0_61] : memref<32x64xf32, #tpu.memory_space<vmem>>, vector<32x64xf32>
      %cst_62 = arith.constant dense<0.000000e+00> : vector<8x64xf32>
      %93 = tpu.matmul %91, %92, %cst_62 {dimension_numbers = #tpu.dot_dimension_numbers<[1], [0], [0], [1], [0, 0, 1, 1], [], []>} : vector<8x32xf32>, vector<32x64xf32>, vector<8x64xf32> -> vector<8x64xf32>
      %c0_63 = arith.constant 0 : index
      %c0_64 = arith.constant 0 : index
      %94 = vector.load %arg12[%c0_63, %c0_64] : memref<1x64xf32, #tpu.memory_space<vmem>>, vector<1x64xf32>
      %95 = vector.broadcast %94 : vector<1x64xf32> to vector<8x64xf32>
      %96 = arith.addf %93, %95 : vector<8x64xf32>
      %cst_65 = arith.constant 0.000000e+00 : f32
      %97 = vector.broadcast %cst_65 : f32 to vector<8x64xf32>
      %98 = arith.maximumf %96, %97 : vector<8x64xf32>
      %c0_66 = arith.constant 0 : index
      %c0_67 = arith.constant 0 : index
      %99 = vector.load %arg13[%c0_66, %c0_67] : memref<64x32xf32, #tpu.memory_space<vmem>>, vector<64x32xf32>
      %cst_68 = arith.constant dense<0.000000e+00> : vector<8x32xf32>
      %100 = tpu.matmul %98, %99, %cst_68 {dimension_numbers = #tpu.dot_dimension_numbers<[1], [0], [0], [1], [0, 0, 1, 1], [], []>} : vector<8x64xf32>, vector<64x32xf32>, vector<8x32xf32> -> vector<8x32xf32>
      %c0_69 = arith.constant 0 : index
      %c0_70 = arith.constant 0 : index
      %101 = vector.load %arg14[%c0_69, %c0_70] : memref<1x32xf32, #tpu.memory_space<vmem>>, vector<1x32xf32>
      %102 = vector.broadcast %101 : vector<1x32xf32> to vector<8x32xf32>
      %103 = arith.addf %100, %102 : vector<8x32xf32>
      %104 = arith.addf %91, %103 : vector<8x32xf32>
      %c0_71 = arith.constant 0 : index
      %c0_72 = arith.constant 0 : index
      %105 = vector.load %arg17[%c0_71, %c0_72] : memref<1x32xf32, #tpu.memory_space<vmem>>, vector<1x32xf32>
      %c0_73 = arith.constant 0 : index
      %c0_74 = arith.constant 0 : index
      %106 = vector.load %arg18[%c0_73, %c0_74] : memref<1x32xf32, #tpu.memory_space<vmem>>, vector<1x32xf32>
      %cst_75 = arith.constant dense<0.000000e+00> : vector<8xf32>
      %107 = vector.multi_reduction <add>, %104, %cst_75 [1] : vector<8x32xf32> to vector<8xf32>
      %108 = vector.shape_cast %107 : vector<8xf32> to vector<8x1xf32>
      %cst_76 = arith.constant 3.200000e+01 : f32
      %109 = vector.broadcast %cst_76 : f32 to vector<8x1xf32>
      %110 = arith.divf %108, %109 : vector<8x1xf32>
      %111 = vector.broadcast %110 : vector<8x1xf32> to vector<8x32xf32>
      %112 = arith.subf %104, %111 : vector<8x32xf32>
      %113 = arith.mulf %112, %112 : vector<8x32xf32>
      %cst_77 = arith.constant dense<0.000000e+00> : vector<8xf32>
      %114 = vector.multi_reduction <add>, %113, %cst_77 [1] : vector<8x32xf32> to vector<8xf32>
      %115 = vector.shape_cast %114 : vector<8xf32> to vector<8x1xf32>
      %cst_78 = arith.constant 3.200000e+01 : f32
      %116 = vector.broadcast %cst_78 : f32 to vector<8x1xf32>
      %117 = arith.divf %115, %116 : vector<8x1xf32>
      %118 = vector.broadcast %110 : vector<8x1xf32> to vector<8x32xf32>
      %119 = arith.subf %104, %118 : vector<8x32xf32>
      %cst_79 = arith.constant 9.99999974E-6 : f32
      %120 = vector.broadcast %cst_79 : f32 to vector<8x1xf32>
      %121 = arith.addf %117, %120 : vector<8x1xf32>
      %122 = math.rsqrt %121 : vector<8x1xf32>
      %123 = vector.broadcast %122 : vector<8x1xf32> to vector<8x32xf32>
      %124 = arith.mulf %119, %123 : vector<8x32xf32>
      %125 = vector.broadcast %105 : vector<1x32xf32> to vector<8x32xf32>
      %126 = arith.mulf %124, %125 : vector<8x32xf32>
      %127 = vector.broadcast %106 : vector<1x32xf32> to vector<8x32xf32>
      %128 = arith.addf %126, %127 : vector<8x32xf32>
      %c0_80 = arith.constant 0 : index
      %c0_81 = arith.constant 0 : index
      %c0_82 = arith.constant 0 : index
      %129 = vector.load %arg19[%c0_80, %c0_81, %c0_82] : memref<1x8x32xf32, #tpu.memory_space<vmem>>, vector<1x8x32xf32>
      %130 = vector.shape_cast %129 : vector<1x8x32xf32> to vector<8x32xf32>
      %131 = vector.shape_cast %128 : vector<8x32xf32> to vector<1x8x32xf32>
      tpu.vector_store %arg19[%c0_80, %c0_81, %c0_82], %131 {strides = array<i32>} : memref<1x8x32xf32, #tpu.memory_space<vmem>>, vector<1x8x32xf32>,
    } else {
    }
    return
  }
  func.func @transform_0(%arg0: i32, %arg1: i32) -> (i32, i32, i32) {
    %c0_i32 = arith.constant 0 : i32
    %c0_i32_0 = arith.constant 0 : i32
    %c0_i32_1 = arith.constant 0 : i32
    return %arg0, %c0_i32, %c0_i32_0 : i32, i32, i32
  }
  func.func @transform_1(%arg0: i32, %arg1: i32) -> (i32, i32, i32) {
    %c0_i32 = arith.constant 0 : i32
    %c0_i32_0 = arith.constant 0 : i32
    %c0_i32_1 = arith.constant 0 : i32
    return %arg1, %c0_i32, %c0_i32_0 : i32, i32, i32
  }
  func.func @transform_2(%arg0: i32, %arg1: i32) -> (i32, i32, i32) {
    %c0_i32 = arith.constant 0 : i32
    %c0_i32_0 = arith.constant 0 : i32
    %c0_i32_1 = arith.constant 0 : i32
    return %arg1, %c0_i32, %c0_i32_0 : i32, i32, i32
  }
  func.func @transform_3(%arg0: i32, %arg1: i32) -> (i32, i32, i32) {
    %c0_i32 = arith.constant 0 : i32
    %c0_i32_0 = arith.constant 0 : i32
    %c0_i32_1 = arith.constant 0 : i32
    return %arg1, %c0_i32, %c0_i32_0 : i32, i32, i32
  }
  func.func @transform_4(%arg0: i32, %arg1: i32) -> (i32, i32, i32) {
    %c0_i32 = arith.constant 0 : i32
    %c0_i32_0 = arith.constant 0 : i32
    %c0_i32_1 = arith.constant 0 : i32
    return %arg1, %c0_i32, %c0_i32_0 : i32, i32, i32
  }
  func.func @transform_5(%arg0: i32, %arg1: i32) -> (i32, i32, i32) {
    %c0_i32 = arith.constant 0 : i32
    %c0_i32_0 = arith.constant 0 : i32
    %c0_i32_1 = arith.constant 0 : i32
    return %arg1, %c0_i32, %c0_i32_0 : i32, i32, i32
  }
  func.func @transform_6(%arg0: i32, %arg1: i32) -> (i32, i32, i32) {
    %c0_i32 = arith.constant 0 : i32
    %c0_i32_0 = arith.constant 0 : i32
    %c0_i32_1 = arith.constant 0 : i32
    return %arg1, %c0_i32, %c0_i32_0 : i32, i32, i32
  }
  func.func @transform_7(%arg0: i32, %arg1: i32) -> (i32, i32) {
    %c0_i32 = arith.constant 0 : i32
    %c0_i32_0 = arith.constant 0 : i32
    %c0_i32_1 = arith.constant 0 : i32
    return %c0_i32, %c0_i32_0 : i32, i32
  }
  func.func @transform_8(%arg0: i32, %arg1: i32) -> (i32, i32) {
    %c0_i32 = arith.constant 0 : i32
    %c0_i32_0 = arith.constant 0 : i32
    %c0_i32_1 = arith.constant 0 : i32
    return %c0_i32, %c0_i32_0 : i32, i32
  }
  func.func @transform_9(%arg0: i32, %arg1: i32) -> (i32, i32) {
    %c0_i32 = arith.constant 0 : i32
    %c0_i32_0 = arith.constant 0 : i32
    %c0_i32_1 = arith.constant 0 : i32
    return %c0_i32, %c0_i32_0 : i32, i32
  }
  func.func @transform_10(%arg0: i32, %arg1: i32) -> (i32, i32) {
    %c0_i32 = arith.constant 0 : i32
    %c0_i32_0 = arith.constant 0 : i32
    %c0_i32_1 = arith.constant 0 : i32
    return %c0_i32, %c0_i32_0 : i32, i32
  }
  func.func @transform_11(%arg0: i32, %arg1: i32) -> (i32, i32) {
    %c0_i32 = arith.constant 0 : i32
    %c0_i32_0 = arith.constant 0 : i32
    %c0_i32_1 = arith.constant 0 : i32
    return %c0_i32, %c0_i32_0 : i32, i32
  }
  func.func @transform_12(%arg0: i32, %arg1: i32) -> (i32, i32) {
    %c0_i32 = arith.constant 0 : i32
    %c0_i32_0 = arith.constant 0 : i32
    %c0_i32_1 = arith.constant 0 : i32
    return %c0_i32, %c0_i32_0 : i32, i32
  }
  func.func @transform_13(%arg0: i32, %arg1: i32) -> (i32, i32) {
    %c0_i32 = arith.constant 0 : i32
    %c0_i32_0 = arith.constant 0 : i32
    %c0_i32_1 = arith.constant 0 : i32
    return %c0_i32, %c0_i32_0 : i32, i32
  }
  func.func @transform_14(%arg0: i32, %arg1: i32) -> (i32, i32) {
    %c0_i32 = arith.constant 0 : i32
    %c0_i32_0 = arith.constant 0 : i32
    %c0_i32_1 = arith.constant 0 : i32
    return %c0_i32, %c0_i32_0 : i32, i32
  }
  func.func @transform_15(%arg0: i32, %arg1: i32) -> (i32, i32) {
    %c0_i32 = arith.constant 0 : i32
    %c0_i32_0 = arith.constant 0 : i32
    %c0_i32_1 = arith.constant 0 : i32
    return %c0_i32, %c0_i32_0 : i32, i32
  }
  func.func @transform_16(%arg0: i32, %arg1: i32) -> (i32, i32) {
    %c0_i32 = arith.constant 0 : i32
    %c0_i32_0 = arith.constant 0 : i32
    %c0_i32_1 = arith.constant 0 : i32
    return %c0_i32, %c0_i32_0 : i32, i32
  }
  func.func @transform_17(%arg0: i32, %arg1: i32) -> (i32, i32, i32) {
    %c0_i32 = arith.constant 0 : i32
    %c0_i32_0 = arith.constant 0 : i32
    %c0_i32_1 = arith.constant 0 : i32
    return %arg0, %c0_i32, %c0_i32_0 : i32, i32, i32
  }
  func.func @transform_18(%arg0: i32, %arg1: i32) -> (i32, i32, i32) {
    %c0_i32 = arith.constant 0 : i32
    %c0_i32_0 = arith.constant 0 : i32
    %c0_i32_1 = arith.constant 0 : i32
    return %arg0, %c0_i32, %c0_i32_0 : i32, i32, i32
  }
}

</mosaic_0001>

<bundles_post_ra>
// kernel: tpu_custom_call.1
= control target key start
LH: loop header
LB: loop body
LE: loop exit
PB: predicated region body
PF: predicated region fallthrough
CT: control target
= control target key end

     0   :  { %s1909_s0 = inlined_call_operand.vmem [shape: f32[2,8,32], index: 0, kind: input, shape index: {}]   ;;  %s1910_s1 = inlined_call_operand.vmem [shape: f32[4,32,8], index: 1, kind: input, shape index: {}]   ;;  %s1911_s2 = inlined_call_operand.vmem [shape: f32[4,32,8], index: 2, kind: input, shape index: {}]   ;;  %s1912_s3 = inlined_call_operand.vmem [shape: f32[4,32,8], index: 3, kind: input, shape index: {}]   ;;  %s1913_s4 = inlined_call_operand.vmem [shape: f32[4,1,8], index: 4, kind: input, shape index: {}]   ;;  %s1914_s5 = inlined_call_operand.vmem [shape: f32[4,1,8], index: 5, kind: input, shape index: {}]   ;;  %s1915_s6 = inlined_call_operand.vmem [shape: f32[4,1,8], index: 6, kind: input, shape index: {}]   ;;  %s1916_s7 = inlined_call_operand.vmem [shape: f32[32,32], index: 7, kind: input, shape index: {}]   ;;  %s1917_s8 = inlined_call_operand.vmem [shape: f32[1,32], index: 8, kind: input, shape index: {}]   ;;  %s1918_s9 = inlined_call_operand.vmem [shape: f32[32,64], index: 9, kind: input, shape index: {}]   ;;  %s1919_s10 = inlined_call_operand.vmem [shape: f32[1,64], index: 10, kind: input, shape index: {}]   ;;  %s1920_s11 = inlined_call_operand.vmem [shape: f32[64,32], index: 11, kind: input, shape index: {}]   ;;  %s1921_s12 = inlined_call_operand.vmem [shape: f32[1,32], index: 12, kind: input, shape index: {}]   ;;  %s1922_s13 = inlined_call_operand.vmem [shape: f32[1,32], index: 13, kind: input, shape index: {}]   ;;  %s1923_s14 = inlined_call_operand.vmem [shape: f32[1,32], index: 14, kind: input, shape index: {}]   ;;  %s1924_s15 = inlined_call_operand.vmem [shape: f32[1,32], index: 15, kind: input, shape index: {}]   ;;  %s1925_s16 = inlined_call_operand.vmem [shape: f32[1,32], index: 16, kind: input, shape index: {}]   ;;  %s1926_s17 = inlined_call_operand.hbm [shape: f32[2,8,32], index: 17, kind: output, shape index: {0}]   ;;  %s1927_s18 = inlined_call_operand.hbm [shape: f32[2,8,8], index: 18, kind: output, shape index: {1}]  }
   0x1   :  { %1941 = sst [smem:[#allocation20_spill]] %s1909_s0 }
   0x2   :  { %1942 = sst [smem:[#allocation21_spill]] %s1910_s1 }
   0x3   :  { %1943 = sst [smem:[#allocation22_spill]] %s1911_s2 }
   0x4   :  { %1944 = sst [smem:[#allocation23_spill]] %s1912_s3 }
   0x5   :  { %1945 = sst [smem:[#allocation24_spill]] %s1913_s4 }
   0x6   :  { %1946 = sst [smem:[#allocation25_spill]] %s1914_s5 }
   0x7   :  { %1947 = sst [smem:[#allocation26_spill]] %s1915_s6 }
   0x8   :  { %1948 = sst [smem:[#allocation27_spill]] %s1926_s17 }
   0x9   :  { %1949 = sst [smem:[#allocation28_spill]] %s1927_s18 }
   0xa   :  { %24 = vsyncpa [#allocation4], 0 }
   0xb   :  { %26 = vsyncpa [#allocation4 + $0x1], 0 }
   0xc   :  { %27 = vsyncpa [#allocation6], 0 }
   0xd   :  { %29 = vsyncpa [#allocation6 + $0x1], 0  ;;  %s1626_s27 = smov 0   ;;  %s1628_s28 = smov 0  }
   0xe   :  { %s1630_s29 = smov 0   ;;  %s1632_s30 = smov 0  }
   0xf   :  { %s1634_s0 = smov 0   ;;  %s1636_s19 = smov 0  }
  0x10   :  { %s1638_s1 = smov 0   ;;  %s1640_s20 = smov 0  }
  0x11 LB: > { %1950 = sst [smem:[#allocation9_spill]] %s1496_s27  ;;  %s1262_s21 = sadd.s32 4294967295, %s1524_s20   ;;  %s1524_s20 = sphi %s1640_s20, %s35_s20   ;;  %s1520_s1 = sphi %s1638_s1, %s1986_s1   ;;  %s1516_s19 = sphi %s1636_s19, %s1985_s19   ;;  %s1512_s0 = sphi %s1634_s0, %s1984_s0   ;;  %s1508_s30 = sphi %s1632_s30, %s1983_s30   ;;  %s1504_s29 = sphi %s1630_s29, %s1982_s29   ;;  %s1500_s28 = sphi %s1628_s28, %s1981_s28   ;;  %s1496_s27 = sphi %s1626_s27, %s1980_s27  }
  0x12   : > { %1951 = sst [smem:[#allocation10_spill]] %s1500_s28  ;;  %s1263_s22 = sadd.s32 4294967294, %s1524_s20  }
  0x13   : > { %1952 = sst [smem:[#allocation11_spill]] %s1504_s29  ;;  %s44_s2 = sadd.s32 1, %s1516_s19 }
  0x14   : > { %1953 = sst [smem:[#allocation12_spill]] %s1516_s19  ;;  %p45_p0 = scmp.ge.s32.totalorder %s44_s2, 4 }
  0x15   : > { %1954 = sst [smem:[#allocation13_spill]] %s1520_s1  ;;  %s47_s23 = sadd.s32 1, %s1520_s1 }
  0x16   : > { %1955 = sst [smem:[#allocation14_spill]] %s1524_s20  ;;  %p456_p1 = scmp.ne.s32.totalorder %s1504_s29, %s1500_s28 }
  0x17   : > { %p457_p2 = scmp.eq.s32.totalorder %s1262_s21, 7  ;;  %s1988_s2 = smov (%p45_p0, %s44_s2), 0 }
  0x18   : > { %1956 = sst [smem:[#allocation15_spill]] %s1988_s2  ;;  %s1990_s23 = smov (!%p45_p0, %s47_s23), %s1520_s1 }
  0x19   : > { %p1675_p3 = por %p457_p2, %p456_p1  ;;  %p462_p4 = scmp.ne.s32.totalorder %s1500_s28, %s1496_s27 }
  0x1a   : > { %p49_p5 = scmp.ge.s32.totalorder %s1990_s23, 2  ;;  %p463_p6 = scmp.eq.s32.totalorder %s1263_s22, 7 }
  0x1b   : > { %s1957_s24 = scalar_select %p1675_p3, 1, 0 }
  0x1c   : > { %p1266_p7 = scmp.ge.s32.totalorder %s1524_s20, 1  ;;  %p586_p8 = scmp.lt.s32.totalorder %s1524_s20, 9 }
  0x1d   : > { %1958 = sst [smem:[#allocation16_spill]] %s1957_s24  ;;  %s1992_s23 = smov (%p49_p5, %s1990_s23), 0 }
  0x1e   : > { %1959 = sst [smem:[#allocation17_spill]] %s1992_s23  ;;  %p1685_p9 = por %p463_p6, %p462_p4 }
  0x1f   : > { %p587_p10 = pnand %p1266_p7, %p586_p8  ;;  %s443_s26 = ssub.s32 %s1520_s1, %s1992_s23 }
  0x20   : > { %s1960_s25 = scalar_select %p1685_p9, 1, 0 }
  0x21   : > { %s446_s21 = sadd.s32 1, %s1504_s29  ;;  %p444_p11 = scmp.eq.s32.totalorder %s443_s26, 0 }
  0x22   : > { %1961 = sst [smem:[#allocation18_spill]] %s1960_s25  ;;  %590 = sbr.rel (%p587_p10) target bundleno = 1816 (0x718), region = 88 }
  0x23   : > { %s1693_s2 = scalar_select %p444_p11, %s1504_s29, %s446_s21  }
  0x24   : > { %p672_p12 = scmp.lt.s32.totalorder (!%p587_p10), %s1508_s30, 3  ;;  %s1697_s22 = sand.u32 (!%p587_p10), 1, %s1500_s28  }
  0x25   : > { %1962 = sst [smem:[#allocation19_spill]] %s1693_s2  ;;  %p668_p13 = scmp.lt.s32.totalorder (!%p587_p10), %s1512_s0, 1 }
  0x26   : > { %s1963_s5 = sld [smem:[#allocation25_spill]] (!%p587_p10)  ;;  %s1970_s29 = sshll.u32 (!%p587_p10), %s1697_s22, 3 }
  0x27   : > { %s1702_s27 = scalar_select %p672_p12, %s1508_s30, 3  ;;  %vm705_vm0 = vcmask 261120   ;;  %vm785_vm1 = vcmask 64512  }
  0x28   : > { %s1964_s25 = sld [smem:[#allocation22_spill]]  ;;  %p1283_p0 = scmp.ne.s32.totalorder %s1508_s30, 0 }
  0x29   : > { %s1705_s23 = sshll.u32 %s1702_s27, 5  ;;  %s1965_s19 = sld [smem:[#allocation21_spill]] }
  0x2a   : > { %s669_s24 = scalar_select %p668_p13, %s1512_s0, 1 }
  0x2b   : > { %s1966_s2 = sld [smem:[#allocation20_spill]] }
  0x2c   : > { %s692_s1 = scalar_lea.vmem %s1963_s5, %s1702_s27  ;;  %s1269_s26 = sshll.u32 %s669_s24, 3 }
  0x2d   : > { %s1967_s4 = sld [smem:[#allocation24_spill]]  ;;  %v1378_v9 = vld [vmem:[%s692_s1] ss:$0 sm:$0xff] }
  0x2e   : > { %s681_s28 = scalar_lea.vmem %s1964_s25, %s1705_s23  ;;  %s1968_s3 = sld [smem:[#allocation23_spill]] }
  0x2f   : > { %s676_s17 = scalar_lea.vmem %s1965_s19, %s1705_s23  ;;  %v732_v0 = vld [vmem:[%s681_s28 + $0x18] sm:$0xff]  ;;  %v731_v1 = vld [vmem:[%s681_s28 + $0x10] sm:$0xff]  ;;  %v730_v4 = vld [vmem:[%s681_s28 + $0x8] sm:$0xff]  ;;  %s1969_s6 = sld [smem:[#allocation26_spill]] }
  0x30   : > { %v700_v2 = vld [vmem:[%s676_s17 + $0x18] sm:$0xff]  ;;  %749 = vmatpush.msra.mxu1 %v732_v0  ;;  %v699_v3 = vld [vmem:[%s676_s17 + $0x10] sm:$0xff]  ;;  %v698_v5 = vld [vmem:[%s676_s17 + $0x8] sm:$0xff] }
  0x31   : > { %721 = vmatpush.msra.mxu0 %v700_v2  ;;  %s671_s25 = scalar_lea.vmem %s1966_s2, %s1269_s26  ;;  %v729_v6 = vld [vmem:[%s681_s28] sm:$0xff]  ;;  %s1752_s2 = scalar_lea.vmem [#allocation3], %s1970_s29 }
  0x32   : > { %750 = vmatpush.msra.mxu1 %v731_v1  ;;  %v697_v7 = vld [vmem:[%s676_s17] sm:$0xff] }
  0x33   : > { %722 = vmatpush.msra.mxu0 %v699_v3  ;;  %v1723_v8 = vld [vmem:[%s671_s25] sm:$0xff]  ;;  %s689_s20 = scalar_lea.vmem %s1967_s4, %s1702_s27  ;;  %s1971_s25 = smov %s1970_s29 }
  0x34   : > { %751 = vmatpush.msra.mxu1 %v730_v4  ;;  %v1379_v10 = vld [vmem:[%s689_s20] ss:$0 sm:$0xff]  ;;  %s686_s24 = scalar_lea.vmem %s1968_s3, %s1705_s23  ;;  %s1756_s18 = scalar_lea.vmem [#allocation5], %s1971_s25 }
  0x35   : > { %723 = vmatpush.msra.mxu0 %v698_v5  ;;  %v760_v15 = vld [vmem:[%s686_s24 + $0x18] sm:$0xff]  ;;  %v759_v16 = vld [vmem:[%s686_s24 + $0x10] sm:$0xff]  ;;  %v758_v17 = vld [vmem:[%s686_s24 + $0x8] sm:$0xff]  ;;  %s695_s21 = scalar_lea.vmem %s1969_s6, %s1702_s27  ;;  %s1282_s27 = sshll.u32 %s1508_s30, 3 }
  0x36   : > { %752 = vmatpush.msra.mxu1 %v729_v6  ;;  %777 = vmatpush.msra.mxu2 %v760_v15  ;;  %v757_v18 = vld [vmem:[%s686_s24] sm:$0xff]  ;;  %s847_s23 = scalar_lea.vmem [#allocation2], %s1282_s27 }
  0x37   : > { %724 = vmatpush.msra.mxu0 %v697_v7  ;;  %1277 = vmatmul.msk.f32.vlgmr.msra.gmra.mxu1 %vm705_vm0, %v1723_v8  ;;  %v1380_v21 = vld [vmem:[%s695_s21] ss:$0 sm:$0xff] }
  0x38   : > { %1276 = vmatmul.msk.f32.vlgmr.msra.gmra.mxu0 %vm705_vm0, %v1723_v8  ;;  %778 = vmatpush.msra.mxu2 %v759_v16 }
  0x3a   : > { %779 = vmatpush.msra.mxu2 %v758_v17 }
  0x3c   : > { %780 = vmatpush.msra.mxu2 %v757_v18 }
  0x3d   : > { %1278 = vmatmul.msk.f32.vlgmr.msra.gmra.mxu2 %vm705_vm0, %v1723_v8 }
  0xb4   : > { %v754_v11 = vpop.f32.mrf.mxu1 }
  0xb5   : > { %v726_v12 = vpop.f32.mrf.mxu0  ;;  %v755_v13 = vadd.f32 %v1378_v9, %v754_v11 }
  0xb6   : > { %v727_v14 = vadd.f32 %v1379_v10, %v726_v12 }
  0xb7   : > { %1279 = vmatpush.xpose.msk.msra.mxu3 %vm785_vm1, %v755_v13 }
  0xba   : > { %1280 = vmatmul.msk.f32.vlgmr.msra.gmra.mxu3 %vm785_vm1, %v727_v14 }
  0xc0   : > { %v782_v22 = vpop.f32.mrf.mxu2 }
  0xc1   : > { %v783_v23 = vadd.f32 %v1380_v21, %v782_v22 }
  0xc3   : > { %841 = vmatpush.msrb.mxu3 %v783_v23 }
 0x13d   : > { %v809_v19 = vpop.f32.mrf.mxu3 }
 0x13e   : > { %v812_v20 = vsel %vm785_vm1, %v809_v19, -inf }
 0x13f   : > { %813 = vmax.xlane.f32.xlu0 %v812_v20 }
 0x1b2   : > { %v814_v24 = vpop.xlane.xlu0 %813 }
 0x1b3   : > { %v815_v25 = vsub.f32 %v809_v19, %v814_v24 }
 0x1b5   : > { %v816_v26 = vmul.f32 1.442695, %v815_v25 }
 0x1b7   : > { %1381 = vpow2.f32 %v816_v26 }
 0x1bd   : > { %v1382_v27 = vpop.eup %1381 }
 0x1be   : > { %v818_v28 = vsel %vm785_vm1, %v1382_v27, 0.0 }
 0x1bf   : > { %819 = vadd.xlane.f32.xlu0 %v818_v28 }
 0x232   : > { %v820_v29 = vpop.xlane.xlu0 %819 }
 0x233   : > { %1383 = vrcp.f32 %v820_v29 }
 0x239   : > { %v1384_v30 = vpop.eup %1383 }
 0x23a   : > { %v822_v31 = vmul.f32 %v1384_v30, %v1382_v27 }
 0x23c   : > { %1281 = vmatmul.msk.f32.vlgmr.msrb.gmra.mxu3 %vm785_vm1, %v822_v31 }
 0x2bc   : > { %852 = sbr.rel (%p1283_p0) target bundleno = 707 (0x2c3), region = 92 }
 0x2bf   : > { %v843_v32 = vpop.f32.mrf.mxu3 }
 0x2c0   : > { %848 = vst.msk [vmem:[%s847_s23] sm:$0xff] %vm785_vm1, %v843_v32 }
 0x2c1   : > { %v1526_v33 = vmov 0.0  }
 0x2c2   : > { %853 = vst.msk [vmem:[%s1756_s18] sm:$0xff] %vm785_vm1, %v1526_v33 }
 0x2c3 PF: > { %v855_v35 = vmul.f32 0.25, %v822_v31  ;;  %p1284_p1 = scmp.ne.s32.totalorder %s1508_s30, 3 }
 0x2c4   : > { %s1527_s19 = smov (!%p1284_p1), 8   ;;  %s1528_s20 = smov (!%p1284_p1), 24  }
 0x2c5   : > { %s1529_s17 = smov (!%p1284_p1), 16  }
 0x2c8   : > { %861 = sbr.rel (%p1284_p1) target bundleno = 1776 (0x6f0), region = 96 }
 0x2c9   : > { %v854_v34 = vld [vmem:[%s1756_s18] sm:$0xff] }
 0x2ca   : > { %v856_v36 = vadd.f32 %v855_v35, %v854_v34 }
 0x2cc   : > { %857 = vst.msk [vmem:[%s1756_s18] sm:$0xff] %vm785_vm1, %v856_v36 }
 0x2cd   : > { %v864_v37 = vld [vmem:[#allocation2 + $0x8] sm:$0xff]  ;;  %v868_v38 = vld [vmem:[#allocation2 + $0x18] sm:$0xff]  ;;  %v866_v39 = vld [vmem:[#allocation2 + $0x10] sm:$0xff]  ;;  %vm882_vm2 = vcmask 130048   ;;  %vm884_vm3 = vcmask 195584   ;;  %v1530_v56 = vmov 32.0  }
 0x2ce   : > { %870 = vrot.lane.b32.xlu0 %v864_v37, %s1527_s19  ;;  %878 = vrot.lane.b32.xlu1 %v868_v38, %s1528_s20  ;;  %v889_v40 = vld [vmem:[%s1916_s7 + $0x18] sm:$0xff]  ;;  %v888_v41 = vld [vmem:[%s1916_s7 + $0x10] sm:$0xff]  ;;  %v862_v45 = vld [vmem:[#allocation2] sm:$0xff]  ;;  %1392 = vrcp.f32 %v1530_v56  ;;  %vm1001_vm8 = vcmask 523264  }
 0x2cf   : > { %909 = vmatpush.msra.mxu0 %v889_v40  ;;  %v887_v42 = vld [vmem:[%s1916_s7 + $0x8] sm:$0xff]  ;;  %v886_v43 = vld [vmem:[%s1916_s7] sm:$0xff]  ;;  %v960_v4 = vld [vmem:[%s1918_s9 + $0x18] sm:$0xff] }
 0x2d0   : > { %v1385_v51 = vld [vmem:[%s1917_s8] ss:$0 sm:$0xff]  ;;  %v959_v5 = vld [vmem:[%s1918_s9 + $0x10] sm:$0xff]  ;;  %980 = vmatpush.msra.mxu1 %v960_v4  ;;  %v958_v6 = vld [vmem:[%s1918_s9 + $0x8] sm:$0xff] }
 0x2d1   : > { %910 = vmatpush.msra.mxu0 %v888_v41  ;;  %v957_v7 = vld [vmem:[%s1918_s9] sm:$0xff]  ;;  %v995_v9 = vld [vmem:[%s1920_s11 + $0x30] sm:$0xff]  ;;  %v994_v10 = vld [vmem:[%s1920_s11 + $0x28] sm:$0xff] }
 0x2d2   : > { %981 = vmatpush.msra.mxu1 %v959_v5  ;;  %v993_v13 = vld [vmem:[%s1920_s11 + $0x20] sm:$0xff]  ;;  %v992_v15 = vld [vmem:[%s1920_s11 + $0x18] sm:$0xff]  ;;  %v991_v28 = vld [vmem:[%s1920_s11 + $0x10] sm:$0xff] }
 0x2d3   : > { %911 = vmatpush.msra.mxu0 %v887_v42  ;;  %v1386_v22 = vld [vmem:[%s1922_s13] ss:$0 sm:$0xff]  ;;  %v990_v29 = vld [vmem:[%s1920_s11 + $0x8] sm:$0xff] }
 0x2d4   : > { %v1393_v57 = vpop.eup %1392  ;;  %982 = vmatpush.msra.mxu1 %v958_v6  ;;  %v1387_v25 = vld [vmem:[%s1923_s14] ss:$0 sm:$0xff] }
 0x2d5   : > { %912 = vmatpush.msra.mxu0 %v886_v43  ;;  %v924_v58 = vmul.f32 32.0, %v1393_v57  ;;  %vm928_vm4 = vweird.f32 %v1393_v57  ;;  %v989_v30 = vld [vmem:[%s1920_s11] sm:$0xff] }
 0x2d6   : > { %874 = vrot.lane.b32.xlu0 %v866_v39, %s1529_s17  ;;  %983 = vmatpush.msra.mxu1 %v957_v7  ;;  %v1388_v31 = vld [vmem:[%s1919_s10] ss:$0 sm:$0xff] }
 0x2d7   : > { %v925_v59 = vsub.f32 1.0, %v924_v58  ;;  %v1389_v35 = vld [vmem:[%s1921_s12] ss:$0 sm:$0xff] }
 0x2d8   : > { %v1391_v56 = vld [vmem:[%s1925_s16] ss:$0 sm:$0xff] }
 0x2d9   : > { %v926_v60 = vmul.f32 %v1393_v57, %v925_v59 }
 0x2db   : > { %v927_v61 = vadd.f32 %v1393_v57, %v926_v60 }
 0x2dd   : > { %v1784_v62 = vsel %vm928_vm4, %v1393_v57, %v927_v61 }
 0x340   : > { %v871_v44 = vpop.permute.xlu0 %870  ;;  %v879_v46 = vpop.permute.xlu1 %878 }
 0x341   : > { %v881_v47 = vsel %vm785_vm1, %v862_v45, %v871_v44 }
 0x348   : > { %v875_v48 = vpop.permute.xlu0 %874 }
 0x349   : > { %v883_v49 = vsel %vm882_vm2, %v881_v47, %v875_v48 }
 0x34a   : > { %v885_v50 = vsel %vm884_vm3, %v883_v49, %v879_v46 }
 0x34b   : > { %1285 = vmatmul.msk.f32.vlgmr.msra.gmra.mxu0 %vm705_vm0, %v885_v50 }
 0x3c8   : > { %v914_v52 = vpop.f32.mrf.mxu0 }
 0x3c9   : > { %v915_v53 = vadd.f32 %v1385_v51, %v914_v52 }
 0x3cb   : > { %v917_v54 = vadd.f32 %v915_v53, %v1723_v8  ;;  %v996_v8 = vld [vmem:[%s1920_s11 + $0x38] sm:$0xff] }
 0x3cc   : > { %1013 = vmatpush.msra.mxu2 %v996_v8 }
 0x3cd   : > { %v920_v55 = vsel %vm705_vm0, %v917_v54, 0.0 }
 0x3ce   : > { %921 = vadd.xlane.f32.xlu1 %v920_v55  ;;  %1014 = vmatpush.msra.mxu2 %v995_v9 }
 0x3d0   : > { %1015 = vmatpush.msra.mxu2 %v994_v10 }
 0x3d2   : > { %1016 = vmatpush.msra.mxu2 %v993_v13 }
 0x3d4   : > { %1017 = vmatpush.msra.mxu2 %v992_v15 }
 0x3d6   : > { %1018 = vmatpush.msra.mxu2 %v991_v28 }
 0x3d8   : > { %1019 = vmatpush.msra.mxu2 %v990_v29 }
 0x3da   : > { %1020 = vmatpush.msra.mxu2 %v989_v30 }
 0x441   : > { %v922_v63 = vpop.xlane.xlu1 %921 }
 0x442   : > { %v930_v0 = vmul.f32 %v1784_v62, %v922_v63 }
 0x444   : > { %v931_v1 = vsub.f32 %v917_v54, %v930_v0  ;;  %v1390_v54 = vld [vmem:[%s1924_s15] ss:$0 sm:$0xff] }
 0x446   : > { %v932_v2 = vmul.f32 %v931_v1, %v931_v1 }
 0x448   : > { %v933_v3 = vsel %vm705_vm0, %v932_v2, 0.0 }
 0x449   : > { %934 = vadd.xlane.f32.xlu2 %v933_v3 }
 0x4bc   : > { %v935_v11 = vpop.xlane.xlu2 %934 }
 0x4bd   : > { %v936_v12 = vmul.f32 %v935_v11, %v1784_v62 }
 0x4bf   : > { %v937_v14 = vadd.f32 1e-05, %v936_v12 }
 0x4c1   : > { %1394 = vrsqrt.f32 %v937_v14  ;;  %vm944_vm6 = vweird.f32 %v937_v14 }
 0x4c7   : > { %v1395_v16 = vpop.eup %1394 }
 0x4c8   : > { %v939_v17 = vmul.f32 %v1395_v16, %v937_v14  ;;  %vm945_vm5 = vweird.f32 %v1395_v16 }
 0x4c9   : > { %vm946_vm7 = vmor %vm944_vm6, %vm945_vm5 }
 0x4ca   : > { %v940_v18 = vmul.f32 %v1395_v16, %v939_v17 }
 0x4cc   : > { %v941_v19 = vmul.f32 0.5, %v940_v18 }
 0x4ce   : > { %v942_v20 = vsub.f32 1.5, %v941_v19 }
 0x4d0   : > { %v943_v21 = vmul.f32 %v1395_v16, %v942_v20 }
 0x4d2   : > { %v947_v23 = vsel %vm946_vm7, %v1395_v16, %v943_v21 }
 0x4d3   : > { %v948_v24 = vmul.f32 %v947_v23, %v931_v1 }
 0x4d5   : > { %v952_v26 = vmul.f32 %v1386_v22, %v948_v24 }
 0x4d7   : > { %v956_v27 = vadd.f32 %v1387_v25, %v952_v26 }
 0x4d9   : > { %1286 = vmatmul.msk.f32.vlgmr.msra.gmra.mxu1 %vm705_vm0, %v956_v27 }
 0x556   : > { %v985_v32 = vpop.f32.mrf.mxu1 }
 0x557   : > { %v986_v33 = vadd.f32 %v1388_v31, %v985_v32 }
 0x559   : > { %v988_v34 = vmax.f32 %v986_v33, 0.0 }
 0x55b   : > { %1287 = vmatmul.msk.f32.vlgmr.msra.gmra.mxu2 %vm1001_vm8, %v988_v34 }
 0x5de   : > { %v1022_v36 = vpop.f32.mrf.mxu2 }
 0x5df   : > { %v1023_v37 = vadd.f32 %v1389_v35, %v1022_v36 }
 0x5e1   : > { %v1025_v38 = vadd.f32 %v1023_v37, %v956_v27 }
 0x5e3   : > { %v1028_v39 = vsel %vm705_vm0, %v1025_v38, 0.0 }
 0x5e4   : > { %1029 = vadd.xlane.f32.xlu2 %v1028_v39 }
 0x657   : > { %v1030_v40 = vpop.xlane.xlu2 %1029 }
 0x658   : > { %v1031_v41 = vmul.f32 %v1030_v40, %v1784_v62 }
 0x65a   : > { %v1032_v42 = vsub.f32 %v1025_v38, %v1031_v41 }
 0x65c   : > { %v1033_v43 = vmul.f32 %v1032_v42, %v1032_v42 }
 0x65e   : > { %v1034_v44 = vsel %vm705_vm0, %v1033_v43, 0.0 }
 0x65f   : > { %1035 = vadd.xlane.f32.xlu0 %v1034_v44 }
 0x6d2   : > { %v1036_v45 = vpop.xlane.xlu0 %1035 }
 0x6d3   : > { %v1037_v46 = vmul.f32 %v1036_v45, %v1784_v62 }
 0x6d5   : > { %v1038_v47 = vadd.f32 1e-05, %v1037_v46 }
 0x6d7   : > { %1396 = vrsqrt.f32 %v1038_v47  ;;  %vm1045_vm10 = vweird.f32 %v1038_v47 }
 0x6dd   : > { %v1397_v48 = vpop.eup %1396 }
 0x6de   : > { %v1040_v49 = vmul.f32 %v1397_v48, %v1038_v47  ;;  %vm1046_vm9 = vweird.f32 %v1397_v48 }
 0x6df   : > { %vm1047_vm11 = vmor %vm1045_vm10, %vm1046_vm9 }
 0x6e0   : > { %v1041_v50 = vmul.f32 %v1397_v48, %v1040_v49 }
 0x6e2   : > { %v1042_v51 = vmul.f32 0.5, %v1041_v50 }
 0x6e4   : > { %v1043_v52 = vsub.f32 1.5, %v1042_v51 }
 0x6e6   : > { %v1044_v53 = vmul.f32 %v1397_v48, %v1043_v52 }
 0x6e8   : > { %v1048_v55 = vsel %vm1047_vm11, %v1397_v48, %v1044_v53 }
 0x6e9   : > { %v1049_v57 = vmul.f32 %v1048_v55, %v1032_v42 }
 0x6eb   : > { %v1053_v58 = vmul.f32 %v1390_v54, %v1049_v57 }
 0x6ed   : > { %v1057_v59 = vadd.f32 %v1391_v56, %v1053_v58 }
 0x6ef   : > { %1058 = vst.msk [vmem:[%s1752_s2] sm:$0xff] %vm705_vm0, %v1057_v59 }
 0x6f0 PF: > { %s1290_s29 = sshll.u32 %s1512_s0, 3  ;;  %s1973_s20 = sld [smem:[#allocation27_spill]] }
 0x6f1   : > { %s1077_s24 = sshll.u32 %s1752_s2, 4  ;;  %s1060_s26 = scalar_lea.sflag [#allocation4], %s1697_s22  ;;  %s1078_s24 = int_to_ptr.vmem [resolvable:$true] %s1077_s24 }
 0x6f6   : > { %s1974_s17 = smov %s1973_s20  ;;  %s1075_s28 = scalar_lea.hbm %s1973_s20, %s1290_s29 }
 0x6f7   : > { %s1079_s1 = sshll.u32 %s1075_s28, 4  ;;  %s1418_s0 = scalar_lea.hbm %s1974_s17, 16  ;;  %s1080_s1 = int_to_ptr.hbm [resolvable:$true] %s1079_s1 }
 0x6f8   : > { %s1412_s30 = sshra.s32 %s1080_s1, 4  ;;  %s1413_s30 = int_to_ptr.hbm [resolvable:$true] %s1412_s30 }
 0x6f9   : > { %s1414_s21 = scalar_lea.hbm %s1413_s30, 8  ;;  %p1419_p6 = scmp.lt.s32.totalorder %s1413_s30, %s1974_s17 }
 0x6fa   : > { %p1415_p2 = scmp.ne.s32.totalorder %s1413_s30, %s1414_s21  ;;  %p1420_p7 = scmp.lt.s32.totalorder %s1418_s0, %s1414_s21 }
 0x6fc   : > { %p1416_p4 = pnand %p1415_p2, %p1675_p3  ;;  %p1421_p8 = por %p1420_p7, %p1419_p6 }
 0x6fe   : > { %p1417_p5 = pneg %p1416_p4 }
 0x700   : > { %p1422_p10 = pnand %p1421_p8, %p1417_p5 }
 0x702   : > { %1425 = shalt.err (!%p1422_p10)
}
 0x703   : > { %1297 = dma.vmem_to_hbm [thread:$0]  (%p1675_p3), %s1078_s24, 128, %s1080_s1, %s1060_s26  }
 0x704   : > { %s1975_s19 = sld [smem:[#allocation28_spill]]  ;;  %s1091_s3 = sshll.u32 %s1756_s18, 4  ;;  %s1092_s3 = int_to_ptr.vmem [resolvable:$true] %s1091_s3 }
 0x705   : > { %s1065_s4 = scalar_lea.sflag [#allocation6], %s1697_s22 }
 0x70a   : > { %s1976_s6 = smov %s1975_s19  ;;  %s1089_s20 = scalar_lea.hbm %s1975_s19, %s1290_s29 }
 0x70b   : > { %s1093_s28 = sshll.u32 %s1089_s20, 4  ;;  %s1446_s24 = scalar_lea.hbm %s1976_s6, 16  ;;  %s1094_s28 = int_to_ptr.hbm [resolvable:$true] %s1093_s28 }
 0x70c   : > { %s1440_s5 = sshra.s32 %s1094_s28, 4  ;;  %s1441_s5 = int_to_ptr.hbm [resolvable:$true] %s1440_s5 }
 0x70d   : > { %s1442_s30 = scalar_lea.hbm %s1441_s5, 8  ;;  %p1447_p0 = scmp.lt.s32.totalorder %s1441_s5, %s1976_s6 }
 0x70e   : > { %p1443_p11 = scmp.ne.s32.totalorder %s1441_s5, %s1442_s30  ;;  %p1448_p1 = scmp.lt.s32.totalorder %s1446_s24, %s1442_s30 }
 0x710   : > { %p1444_p12 = pnand %p1443_p11, %p1675_p3  ;;  %p1449_p2 = por %p1448_p1, %p1447_p0 }
 0x712   : > { %p1445_p13 = pneg %p1444_p12 }
 0x714   : > { %p1450_p4 = pnand %p1449_p2, %p1445_p13 }
 0x716   : > { %1453 = shalt.err (!%p1450_p4)
}
 0x717   : > { %1298 = dma.vmem_to_hbm [thread:$0]  (%p1675_p3), %s1092_s3, 128, %s1094_s28, %s1065_s4  }
 0x718 PF: > { %s1977_s22 = sld [smem:[#allocation14_spill]] }
 0x719   : > { %s1978_s18 = sld [smem:[#allocation9_spill]] }
 0x71e   : > { %p1308_p5 = scmp.ge.s32.totalorder %s1977_s22, 2 }
 0x71f   : > { %s1105_s0 = sand.u32 1, %s1978_s18  }
 0x720   : > { %p1302_p6 = pnand %p1308_p5, %p1685_p9  ;;  %s1106_s2 = scalar_lea.sflag [#allocation4], %s1105_s0 }
 0x722   : > { %p1303_p7 = pneg %p1302_p6 }
 0x724   : > { %1487 = dma.done.wait (%p1303_p7), %s1106_s2, 128  }
 0x725   : > { %1489 = vsyncadd (%p1303_p7), %s1106_s2, 4294967168  ;;  %s1116_s25 = scalar_lea.sflag [#allocation6], %s1105_s0 }
 0x726   : > { %1491 = dma.done.wait (%p1303_p7), %s1116_s25, 128  }
 0x727   : > { %1493 = vsyncadd (%p1303_p7), %s1116_s25, 4294967168  ;;  %s35_s20 = sadd.s32 1, %s1977_s22   ;;  %s1980_s27 = sld [smem:[#allocation10_spill]] }
 0x728   : > { %p32_p8 = scmp.ge.s32.totalorder %s35_s20, 10   ;;  %s1981_s28 = sld [smem:[#allocation11_spill]] }
 0x729   : > { %s1982_s29 = sld [smem:[#allocation19_spill]] }
 0x72a   : > { %s1983_s30 = sld [smem:[#allocation12_spill]]  ;;  %34 = sbr.rel (!%p32_p8) target bundleno = 17 (0x11), region = 170 }
 0x72b   : > { %s1984_s0 = sld [smem:[#allocation13_spill]] }
 0x72c   : > { %s1985_s19 = sld [smem:[#allocation15_spill]] }
 0x72d   : > { %s1986_s1 = sld [smem:[#allocation17_spill]] }
 0x72f   :  { %1122 = vsyncpa [#allocation4], 1 }
 0x730   :  { %1124 = vsyncpa [#allocation4 + $0x1], 1 }
 0x731   :  { %1125 = vsyncpa [#allocation6], 1 }
 0x732   :  { %1127 = vsyncpa [#allocation6 + $0x1], 1 }

</bundles_post_ra>
